<compile_context>
chip_gen: v7x
topology: tpu7x:2x2x1
jax: 0.10.0
libtpu: 0.0.40
codegen_flags: <defaults>
</compile_context>

<pallas_src>
import functools

import jax
import jax.numpy as jnp
from jax.experimental import pallas as pl
from jax.experimental.pallas import tpu as pltpu


def _round_up(x, m):
    return ((x + m - 1) // m) * m


def _vmem_limit_bytes():
    # ~75% of physical VMEM, capped at 64 MiB (=> ~48 MiB on v7x, 64 MiB on
    # v5e/v6e), leaving headroom for compiler-internal scratch.
    try:
        cap = pltpu.get_tpu_info().vmem_capacity_bytes
    except Exception:
        cap = 128 * 1024 * 1024
    return min(64 * 1024 * 1024, int(cap * 3) // 4)


# -----------------------------------------------------------------------------
# Kernels
# -----------------------------------------------------------------------------
def _td_linear_resident_kernel(x_ref, w_ref, b_ref, o_ref):
    # Weight-resident path: the full [F_in, F_out] weight stays in VMEM across
    # all grid steps; one row tile of x streams per step.  Single MXU dot with
    # f32 accumulation, then f32 bias add.
    acc = jnp.dot(x_ref[...], w_ref[...], preferred_element_type=jnp.float32)
    o_ref[...] = (acc + b_ref[...].astype(jnp.float32)).astype(o_ref.dtype)


def _td_linear_tiled_kernel(x_ref, w_ref, b_ref, o_ref, acc_ref):
    # General K-blocked fallback: f32 VMEM accumulator resident across K axis.
    # Weight arrives pre-transposed as a [tk, tn] tile -> plain dot, no vxpose.
    k = pl.program_id(2)

    @pl.when(k == 0)
    def _():
        acc_ref[...] = jnp.zeros_like(acc_ref)

    acc_ref[...] += jnp.dot(x_ref[...], w_ref[...],
                            preferred_element_type=jnp.float32)

    @pl.when(k == pl.num_programs(2) - 1)
    def _():
        # Bias added exactly once, in the finalize branch.
        o_ref[...] = (acc_ref[...] + b_ref[...].astype(jnp.float32)).astype(o_ref.dtype)


# -----------------------------------------------------------------------------
# Wrapper
# -----------------------------------------------------------------------------
@functools.partial(jax.jit, static_argnames=("batch_first", "tm", "tn", "tk"))
def time_distributed_linear(x, weight, bias, batch_first=True,
                            tm=1024, tn=512, tk=512):
    """Pallas equivalent of TimeDistributed(nn.Linear(F_in, F_out))(x).

    x:      [..., F_in]       (any rank >= 1)
    weight: [F_out, F_in]     (PyTorch layout)
    bias:   [F_out]
    """
    orig_ndim = x.ndim
    f_in = x.shape[-1]
    f_out = weight.shape[0]

    # Flatten leading dims exactly like x.contiguous().view(-1, x.size(-1)).
    if orig_ndim == 1:
        x_flat = x.reshape(1, f_in)
    elif orig_ndim == 2:
        x_flat = x
    else:
        x_flat = x.reshape(-1, f_in)
    n = x_flat.shape[0]

    out_dtype = x.dtype
    compute_dtype = jnp.bfloat16          # bf16 MXU operands
    sublane = 16                          # dtype-aware sublane rounding (bf16)
    cbytes = 2
    obytes = jnp.dtype(out_dtype).itemsize

    x_c = x_flat.astype(compute_dtype)
    # One-time wrapper transpose to [F_in, F_out]; amortized over all row tiles.
    w_t = weight.T.astype(compute_dtype)
    b_f32 = bias.astype(jnp.float32)

    vmem_limit = _vmem_limit_bytes()
    budget = int(vmem_limit * 0.9)
    flops = 2 * n * f_in * f_out

    # Lane-dense output: pad F_out (weight/bias/out only) to a 128 multiple so
    # stores are unmasked.  x is never padded/copied on the resident path.
    fout_pad = _round_up(f_out, 128)

    def _resident_footprint(tm_):
        return (f_in * fout_pad * cbytes           # resident weight
                + fout_pad * 4                     # bias (f32)
                + 2 * tm_ * f_in * cbytes          # x row tile, double-buffered
                + 2 * tm_ * fout_pad * obytes)     # out row tile, double-buffered

    tm_res = min(tm, _round_up(n, sublane))
    if n > sublane:
        # Keep at least 2 row tiles when possible so the parallel row axis can
        # be split across both TensorCores on v7x.
        tm_res = min(tm_res, _round_up(pl.cdiv(n, 2), sublane))
    while tm_res > sublane and _resident_footprint(tm_res) > budget:
        tm_res = max(sublane, _round_up(tm_res // 2, sublane))
    use_resident = _resident_footprint(tm_res) <= budget

    if use_resident:
        # --------------------------------------------------------------
        # Fast path: weight-resident single streaming pass over rows.
        # --------------------------------------------------------------
        w_p = w_t if fout_pad == f_out else jnp.pad(
            w_t, ((0, 0), (0, fout_pad - f_out)))
        b2d = (b_f32 if fout_pad == f_out
               else jnp.pad(b_f32, (0, fout_pad - f_out))).reshape(1, fout_pad)

        grid = (pl.cdiv(n, tm_res),)   # ragged last row tile handled by Pallas
        cost = pl.CostEstimate(
            flops=flops, transcendentals=0,
            bytes_accessed=(n * f_in * cbytes + f_in * fout_pad * cbytes
                            + fout_pad * 4 + n * fout_pad * obytes))

        y_pad = pl.pallas_call(
            _td_linear_resident_kernel,
            out_shape=jax.ShapeDtypeStruct((n, fout_pad), out_dtype),
            grid=grid,
            in_specs=[
                pl.BlockSpec((tm_res, f_in), lambda i: (i, 0)),     # x rows
                pl.BlockSpec((f_in, fout_pad), lambda i: (0, 0)),   # resident W^T
                pl.BlockSpec((1, fout_pad), lambda i: (0, 0)),      # bias
            ],
            out_specs=pl.BlockSpec((tm_res, fout_pad), lambda i: (i, 0)),
            compiler_params=pltpu.CompilerParams(
                dimension_semantics=("parallel",),
                vmem_limit_bytes=vmem_limit,
            ),
            cost_estimate=cost,
        )(x_c, w_p, b2d)
        y_flat = y_pad[:, :f_out] if fout_pad != f_out else y_pad
    else:
        # --------------------------------------------------------------
        # Fallback: K-blocked tiling (huge feature dims), f32 accumulator.
        # --------------------------------------------------------------
        tm_ = min(tm, _round_up(n, sublane))
        tk_ = min(tk, _round_up(f_in, 128))
        tn_ = min(tn, _round_up(f_out, 128))

        n_pad = _round_up(n, tm_)
        fin_pad = _round_up(f_in, tk_)
        fo_pad = _round_up(f_out, tn_)

        x_p = x_c
        if (n_pad, fin_pad) != (n, f_in):
            # Zero-pad K columns (required for correct accumulation); row pad
            # folded into the same single materialization.
            x_p = jnp.pad(x_c, ((0, n_pad - n), (0, fin_pad - f_in)))
        w_p = w_t
        if (fin_pad, fo_pad) != (f_in, f_out):
            w_p = jnp.pad(w_t, ((0, fin_pad - f_in), (0, fo_pad - f_out)))
        b2d = (b_f32 if fo_pad == f_out
               else jnp.pad(b_f32, (0, fo_pad - f_out))).reshape(1, fo_pad)

        grid = (n_pad // tm_, fo_pad // tn_, fin_pad // tk_)
        cost = pl.CostEstimate(
            flops=flops, transcendentals=0,
            bytes_accessed=(n_pad * fin_pad * cbytes
                            + (n_pad // tm_) * fin_pad * fo_pad * cbytes
                            + fo_pad * 4 + n_pad * fo_pad * obytes))

        y_pad = pl.pallas_call(
            _td_linear_tiled_kernel,
            out_shape=jax.ShapeDtypeStruct((n_pad, fo_pad), out_dtype),
            grid=grid,
            in_specs=[
                pl.BlockSpec((tm_, tk_), lambda i, j, k: (i, k)),   # x
                pl.BlockSpec((tk_, tn_), lambda i, j, k: (k, j)),   # W^T tile
                pl.BlockSpec((1, tn_), lambda i, j, k: (0, j)),     # bias
            ],
            out_specs=pl.BlockSpec((tm_, tn_), lambda i, j, k: (i, j)),
            scratch_shapes=[pltpu.VMEM((tm_, tn_), jnp.float32)],
            compiler_params=pltpu.CompilerParams(
                dimension_semantics=("parallel", "parallel", "arbitrary"),
                vmem_limit_bytes=vmem_limit,
            ),
            cost_estimate=cost,
        )(x_p, w_p, b2d)
        y_flat = y_pad[:n, :f_out]

    # Reshape back per TimeDistributed semantics.
    if orig_ndim == 1:
        return y_flat.reshape(f_out)
    if orig_ndim == 2:
        return y_flat
    if batch_first:
        return y_flat.reshape(x.shape[0], -1, f_out)   # (B, -1, F_out)
    return y_flat.reshape(-1, x.shape[1], f_out)       # (-1, T, F_out)


if __name__ == "__main__":
    # Small shapes: batch=2, seq=8, hidden(in)=32, hidden(out)=64
    B, T, F_IN, F_OUT = 2, 8, 32, 64

    key = jax.random.PRNGKey(0)
    kx, kw, kb = jax.random.split(key, 3)

    x = jax.random.normal(kx, (B, T, F_IN), dtype=jnp.float32)
    # Deterministic synthetic Linear params (PyTorch layout: [F_OUT, F_IN]).
    weight = jax.random.normal(kw, (F_OUT, F_IN), dtype=jnp.float32) * (1.0 / F_IN**0.5)
    bias = jax.random.normal(kb, (F_OUT,), dtype=jnp.float32) * 0.01

    y = time_distributed_linear(x, weight, bias, batch_first=True)
    y = jax.block_until_ready(y)

    # Reference check against plain JAX (same semantics as the PyTorch module).
    # Tolerance loosened for bf16 MXU operands (f32 accumulation in-kernel).
    y_ref = (x.reshape(-1, F_IN) @ weight.T + bias).reshape(B, -1, F_OUT)
    assert y.shape == (B, T, F_OUT), y.shape
    assert jnp.allclose(y, y_ref, atol=2e-2, rtol=2e-2), (
        float(jnp.max(jnp.abs(y - y_ref))))

    print("KERNEL_OK")
</pallas_src>

<mosaic_0001>
module attributes {stable_mosaic.version = 11 : i64} {
  func.func @_td_linear_resident_kernel(%arg0: i32, %arg1: memref<16x32xbf16, #tpu.memory_space<vmem>>, %arg2: memref<32x128xbf16, #tpu.memory_space<vmem>>, %arg3: memref<1x128xf32, #tpu.memory_space<vmem>>, %arg4: memref<16x128xf32, #tpu.memory_space<vmem>>) attributes {dimension_semantics = [#tpu.dimension_semantics<parallel>], iteration_bounds = array<i64: 1>, scalar_prefetch = 0 : i64, scratch_operands = 0 : i64, tpu.core_type = #tpu.core_type<tc>, window_params = [{transform_indices = @transform_0, window_bounds = array<i64: 16, 32>}, {pipeline_mode = #tpu.pipeline_mode<synchronous>, transform_indices = @transform_1, window_bounds = array<i64: 32, 128>}, {pipeline_mode = #tpu.pipeline_mode<synchronous>, transform_indices = @transform_2, window_bounds = array<i64: 1, 128>}, {transform_indices = @transform_3, window_bounds = array<i64: 16, 128>}]} {
    %c0 = arith.constant 0 : index
    %c0_0 = arith.constant 0 : index
    %0 = vector.load %arg1[%c0, %c0_0] : memref<16x32xbf16, #tpu.memory_space<vmem>>, vector<16x32xbf16>
    %c0_1 = arith.constant 0 : index
    %c0_2 = arith.constant 0 : index
    %1 = vector.load %arg2[%c0_1, %c0_2] : memref<32x128xbf16, #tpu.memory_space<vmem>>, vector<32x128xbf16>
    %cst = arith.constant dense<0.000000e+00> : vector<16x128xf32>
    %2 = tpu.matmul %0, %1, %cst {dimension_numbers = #tpu.dot_dimension_numbers<[1], [0], [0], [1], [0, 0, 1, 1], [], []>} : vector<16x32xbf16>, vector<32x128xbf16>, vector<16x128xf32> -> vector<16x128xf32>
    %c0_3 = arith.constant 0 : index
    %c0_4 = arith.constant 0 : index
    %3 = vector.load %arg3[%c0_3, %c0_4] : memref<1x128xf32, #tpu.memory_space<vmem>>, vector<1x128xf32>
    %4 = vector.broadcast %3 : vector<1x128xf32> to vector<16x128xf32>
    %5 = arith.addf %2, %4 : vector<16x128xf32>
    %c0_5 = arith.constant 0 : index
    %c0_6 = arith.constant 0 : index
    %6 = vector.load %arg4[%c0_5, %c0_6] : memref<16x128xf32, #tpu.memory_space<vmem>>, vector<16x128xf32>
    tpu.vector_store %arg4[%c0_5, %c0_6], %5 {strides = array<i32>} : memref<16x128xf32, #tpu.memory_space<vmem>>, vector<16x128xf32>,
    return
  }
  func.func @transform_0(%arg0: i32) -> (i32, i32) {
    %c0_i32 = arith.constant 0 : i32
    %c0_i32_0 = arith.constant 0 : i32
    return %arg0, %c0_i32 : i32, i32
  }
  func.func @transform_1(%arg0: i32) -> (i32, i32) {
    %c0_i32 = arith.constant 0 : i32
    %c0_i32_0 = arith.constant 0 : i32
    %c0_i32_1 = arith.constant 0 : i32
    return %c0_i32, %c0_i32_0 : i32, i32
  }
  func.func @transform_2(%arg0: i32) -> (i32, i32) {
    %c0_i32 = arith.constant 0 : i32
    %c0_i32_0 = arith.constant 0 : i32
    %c0_i32_1 = arith.constant 0 : i32
    return %c0_i32, %c0_i32_0 : i32, i32
  }
  func.func @transform_3(%arg0: i32) -> (i32, i32) {
    %c0_i32 = arith.constant 0 : i32
    %c0_i32_0 = arith.constant 0 : i32
    return %arg0, %c0_i32 : i32, i32
  }
}

</mosaic_0001>

<bundles_post_ra>
// kernel: time_distributed_linear.1
= control target key start
LH: loop header
LB: loop body
LE: loop exit
PB: predicated region body
PF: predicated region fallthrough
CT: control target
= control target key end

     0   :  { %8 = vsyncpa [#allocation3], 0  ;;  %s358_s0 = inlined_call_operand.hbm [shape: bf16[16,32], index: 0, kind: input, shape index: {}]   ;;  %s359_s1 = inlined_call_operand.hbm [shape: bf16[32,128], index: 1, kind: input, shape index: {}]   ;;  %s360_s2 = inlined_call_operand.hbm [shape: f32[1,128], index: 2, kind: input, shape index: {}]   ;;  %s361_s3 = inlined_call_operand.hbm [shape: f32[16,128], index: 3, kind: output, shape index: {}]  }
   0x1   :  { %9 = vsyncpa [#allocation6], 0 }
   0x2   :  { %10 = vsyncpa [#allocation4], 0  ;;  %s273_s12 = smov [#allocation5]   ;;  %s274_s14 = smov [#allocation2]  }
   0x3   :  { %s28_s13 = sshll.u32 %s273_s12, 4  ;;  %s16_s15 = sshll.u32 %s274_s14, 4  ;;  %s29_s13 = int_to_ptr.vmem [resolvable:$true] %s28_s13  ;;  %s303_s15 = int_to_ptr.vmem [resolvable:$true] %s16_s15 }
   0x4   :  { %s179_s18 = scalar_lea.hbm %s359_s1, 256 }
   0x5   :  { %p180_p0 = scmp.ne.s32.totalorder %s359_s1, %s179_s18  ;;  %p183_p1 = scmp.lt.u32.totalorder %s179_s18, %s359_s1 }
   0x7   :  { %p185_p2 = pnand %p183_p1, %p180_p0 }
   0x9   :  { %188 = shalt.err (!%p185_p2)
}
   0xa   :  { %s189_s23 = scalar_lea.vmem %s29_s13, 256  ;;  %p194_p4 = scmp.lt.s32.totalorder %s29_s13, %s29_s13 }
   0xb   :  { %p190_p3 = scmp.ne.s32.totalorder %s29_s13, %s189_s23  ;;  %p195_p5 = scmp.lt.s32.totalorder %s189_s23, %s189_s23 }
   0xd   :  { %p196_p6 = por %p195_p5, %p194_p4 }
   0xf   :  { %p197_p7 = pnand %p196_p6, %p190_p3 }
  0x11   :  { %200 = shalt.err (!%p197_p7)
}
  0x12   :  { %s275_s24 = smov 64   ;;  %s276_s25 = smov 4  }
  0x13   :  { %34 = dma.hbm_to_vmem [thread:$0]  %s359_s1, 256, %s29_s13, [#allocation6], %s275_s24, %s275_s24, %s276_s25  }
  0x14   :  { %s201_s30 = scalar_lea.hbm %s358_s0, 128 }
  0x15   :  { %p202_p8 = scmp.ne.s32.totalorder %s358_s0, %s201_s30  ;;  %p205_p9 = scmp.lt.u32.totalorder %s201_s30, %s358_s0 }
  0x17   :  { %p207_p10 = pnand %p205_p9, %p202_p8 }
  0x19   :  { %210 = shalt.err (!%p207_p10)
}
  0x1a   :  { %s211_s8 = scalar_lea.vmem %s303_s15, 128  ;;  %p216_p12 = scmp.lt.s32.totalorder %s303_s15, %s303_s15 }
  0x1b   :  { %p212_p11 = scmp.ne.s32.totalorder %s303_s15, %s211_s8  ;;  %p217_p13 = scmp.lt.s32.totalorder %s211_s8, %s211_s8 }
  0x1d   :  { %p218_p0 = por %p217_p13, %p216_p12 }
  0x1f   :  { %p219_p1 = pnand %p218_p0, %p212_p11 }
  0x21   :  { %222 = shalt.err (!%p219_p1)
}
  0x22   :  { %22 = dma.hbm_to_vmem [thread:$0]  %s358_s0, 128, %s303_s15, [#allocation3], %s275_s24, %s275_s24, %s276_s25  }
  0x23   :  { %s277_s10 = smov [#allocation7]   ;;  %s223_s14 = scalar_lea.hbm %s360_s2, 16 }
  0x24   :  { %s41_s11 = sshll.u32 %s277_s10, 4  ;;  %p224_p2 = scmp.ne.s32.totalorder %s360_s2, %s223_s14  ;;  %s42_s11 = int_to_ptr.vmem [resolvable:$true] %s41_s11 }
  0x25   :  { %p227_p3 = scmp.lt.u32.totalorder %s223_s14, %s360_s2 }
  0x27   :  { %p229_p4 = pnand %p227_p3, %p224_p2 }
  0x29   :  { %232 = shalt.err (!%p229_p4)
}
  0x2a   :  { %s233_s20 = scalar_lea.vmem %s42_s11, 16  ;;  %s237_s0 = scalar_lea.vmem %s42_s11, 32 }
  0x2b   :  { %p234_p5 = scmp.ne.s32.totalorder %s42_s11, %s233_s20  ;;  %p238_p6 = scmp.lt.s32.totalorder %s42_s11, %s42_s11 }
  0x2c   :  { %p239_p7 = scmp.lt.s32.totalorder %s237_s0, %s233_s20 }
  0x2e   :  { %p240_p8 = por %p239_p7, %p238_p6 }
  0x30   :  { %p241_p9 = pnand %p240_p8, %p234_p5 }
  0x32   :  { %244 = shalt.err (!%p241_p9)
}
  0x33   :  { %44 = dma.hbm_to_vmem [thread:$0]  %s360_s2, 16, %s42_s11, [#allocation6]  }
  0x34   :  { %267 = dma.done.wait [#allocation3], 128  }
  0x35   :  { %268 = vsyncadd [#allocation3], 4294967168 }
  0x36   :  { %269 = dma.done.wait [#allocation6], 272  }
  0x37   :  { %270 = vsyncadd [#allocation6], 4294967024  ;;  %v278_v0 = vmov 0.0   ;;  %vm279_vm0 = vmmov 0   ;;  %v176_v1 = vld [vmem:[#allocation5] sm:$0xff]   ;;  %v177_v2 = vld [vmem:[#allocation5 + $0x8] sm:$0xff]  }
  0x38   :  { %158 = vmatprep.subr.bf16.mxu0 %v278_v0  ;;  %162 = vmatprep.mubr.msk.bf16.mxu0 %vm279_vm0, %v278_v0  ;;  %v178_v3 = vld [vmem:[#allocation2] sm:$0xff]   ;;  %vm85_vm1 = vcmask 261120   ;;  %v150_v4 = vld [vmem:[#allocation7] ss:$0 sm:$0xff]  ;;  %s280_s22 = smov [#allocation8]  }
  0x39   :  { %159 = vmatpush3.bf16.msra.mxu0 %v176_v1  ;;  %s137_s23 = sshll.u32 %s280_s22, 4  ;;  %s138_s23 = int_to_ptr.vmem [resolvable:$true] %s137_s23 }
  0x3a   :  { %160 = vmatprep.subr.bf16.mxu0 %v278_v0  ;;  %s245_s2 = scalar_lea.vmem %s138_s23, 256  ;;  %p250_p11 = scmp.lt.s32.totalorder %s138_s23, %s138_s23 }
  0x3b   :  { %p246_p10 = scmp.ne.s32.totalorder %s138_s23, %s245_s2  ;;  %p251_p12 = scmp.lt.s32.totalorder %s245_s2, %s245_s2 }
  0x3d   :  { %161 = vmatpush3.bf16.msra.mxu0 %v177_v2  ;;  %p252_p13 = por %p251_p12, %p250_p11 }
  0x3f   :  { %p253_p0 = pnand %p252_p13, %p246_p10 }
  0x40   :  { %163 = vmatmul.mubr.msk.bf16.vlgmr.msra.gmra.mrb[0].mxu0 %vm85_vm1, %v178_v3 }
 0x113   :  { %v123_v5 = vpop.f32.mrb[0].mxu0 }
 0x114   :  { %v124_v6 = vadd.f32 %v150_v4, %v123_v5  ;;  %v164_v7 = vpop.f32.mrb[1].mxu0 }
 0x115   :  { %v126_v8 = vpop.f32.mrb[2].mxu0 }
 0x116   :  { %130 = vst [vmem:[#allocation8] sm:$0xff] %v124_v6  ;;  %v127_v9 = vadd.f32 %v150_v4, %v126_v8  ;;  %v165_v10 = vpop.f32.mrb[3].mxu0 }
 0x118   :  { %131 = vst [vmem:[#allocation8 + $0x8] sm:$0xff] %v127_v9 }
 0x119   :  { %256 = shalt.err (!%p253_p0)
}
 0x11a   :  { %s257_s26 = scalar_lea.hbm %s361_s3, 256 }
 0x11b   :  { %p258_p1 = scmp.ne.s32.totalorder %s361_s3, %s257_s26  ;;  %p261_p2 = scmp.lt.u32.totalorder %s257_s26, %s361_s3 }
 0x11d   :  { %p263_p3 = pnand %p261_p2, %p258_p1 }
 0x11f   :  { %266 = shalt.err (!%p263_p3)
}
 0x120   :  { %s281_s4 = smov 128   ;;  %s282_s5 = smov 8  }
 0x121   :  { %143 = dma.vmem_to_hbm [thread:$0]  %s138_s23, 256, %s361_s3, [#allocation4], %s281_s4, %s281_s4, %s282_s5  }
 0x122   :  { %271 = dma.done.wait [#allocation4], 256  }
 0x123   :  { %272 = vsyncadd [#allocation4], 4294967040 }
 0x124   :  { %147 = vsyncpa [#allocation3], 1 }
 0x125   :  { %148 = vsyncpa [#allocation6], 1 }
 0x126   :  { %149 = vsyncpa [#allocation4], 1 }

</bundles_post_ra>
